<compile_context>
chip_gen: v7x
topology: tpu7x:2x2x1
jax: 0.10.0
libtpu: 0.0.40
codegen_flags: <defaults>
</compile_context>

<pallas_src>
import jax
import jax.numpy as jnp
from jax.experimental import pallas as pl
from jax.experimental.pallas import tpu as pltpu

IMG_H, IMG_W = 28, 28
OUT_DIM = IMG_H * IMG_W          # 784
SUBLANE_BF16 = 16                # bf16 sublane tile (packed pairs)


def _cdiv(a, b):
    return (a + b - 1) // b


def _round_up(x, m):
    return _cdiv(x, m) * m


def bernoulli_decoder_kernel(z_ref, w1_ref, b1_ref, w2_ref, b2_ref, logits_ref):
    """Per-batch-tile kernel: MLP decoder producing Bernoulli logits.

    z_ref:      (TB, M)       bf16
    w1_ref:     (M,  H)       bf16   (resident: constant index_map, DMA'd once)
    b1_ref:     (1,  H)       f32
    w2_ref:     (H,  784)     bf16   (resident)
    b2_ref:     (1,  784)     f32
    logits_ref: (TB, 784)     bf16   (Bernoulli logits; f32 accumulation in-kernel)
    """
    # Hidden layer: ReLU(z @ W1 + b1) — bf16 MXU matmul, f32 accumulate.
    h = jnp.dot(z_ref[...], w1_ref[...], preferred_element_type=jnp.float32)
    h = jnp.maximum(h + b1_ref[...], 0.0)

    # Output layer: logits = h @ W2 + b2 (cast activations to bf16 for the MXU).
    logits = jnp.dot(h.astype(w2_ref.dtype), w2_ref[...],
                     preferred_element_type=jnp.float32) + b2_ref[...]

    # bf16 store halves HBM writeback on this writeback-bound kernel.
    logits_ref[...] = logits.astype(logits_ref.dtype)


def prepare_decoder_params(params):
    """One-time device-param prep (hoisted out of the per-call forward path)."""
    return {
        "w1": params["w1"].astype(jnp.bfloat16),
        "b1": params["b1"].reshape(1, -1).astype(jnp.float32),
        "w2": params["w2"].astype(jnp.bfloat16),
        "b2": params["b2"].reshape(1, -1).astype(jnp.float32),
    }


def bernoulli_decoder_forward(z, dparams, *, tb_max=1024, min_tiles=2):
    """Latents z (B, M) -> Bernoulli logits (B, 28, 28), bf16.

    Pallas equivalent of `BernoulliDecoder(decoder_net)(z)`: the returned logits fully
    parameterize td.Independent(td.Bernoulli(logits=logits), 2); probs, if needed, is
    jax.nn.sigmoid(logits), computed lazily downstream.
    """
    B, M = z.shape
    H = dparams["w1"].shape[1]
    assert dparams["w2"].shape == (H, OUT_DIM)

    z_bf = z.astype(jnp.bfloat16)

    # Balanced batch tiling:
    #  * at least `min_tiles` tiles so v7x megacore gets both TensorCores busy,
    #  * tb a multiple of 16 (bf16 sublane packing), capped at tb_max,
    #  * padding waste limited to < one 16-row group per tile.
    n_tiles = max(min_tiles, _cdiv(B, tb_max))
    tb = min(tb_max, max(SUBLANE_BF16, _round_up(_cdiv(B, n_tiles), SUBLANE_BF16)))
    n_tiles = _cdiv(B, tb)
    b_pad = n_tiles * tb
    if b_pad != B:
        z_bf = jnp.pad(z_bf, ((0, b_pad - B), (0, 0)))
    grid = (n_tiles,)

    cost = pl.CostEstimate(
        flops=2 * b_pad * (M * H + H * OUT_DIM),
        transcendentals=0,
        bytes_accessed=(z_bf.size * 2
                        + dparams["w1"].size * 2 + dparams["b1"].size * 4
                        + dparams["w2"].size * 2 + dparams["b2"].size * 4
                        + b_pad * OUT_DIM * 2),
    )

    logits_flat = pl.pallas_call(
        bernoulli_decoder_kernel,
        out_shape=jax.ShapeDtypeStruct((b_pad, OUT_DIM), jnp.bfloat16),
        grid_spec=pltpu.PrefetchScalarGridSpec(
            num_scalar_prefetch=0,
            grid=grid,
            in_specs=[
                pl.BlockSpec((tb, M), lambda i: (i, 0)),        # z: tiled over batch
                pl.BlockSpec((M, H), lambda i: (0, 0)),         # W1: resident
                pl.BlockSpec((1, H), lambda i: (0, 0)),         # b1: resident
                pl.BlockSpec((H, OUT_DIM), lambda i: (0, 0)),   # W2: resident
                pl.BlockSpec((1, OUT_DIM), lambda i: (0, 0)),   # b2: resident
            ],
            out_specs=pl.BlockSpec((tb, OUT_DIM), lambda i: (i, 0)),
        ),
        compiler_params=pltpu.CompilerParams(
            dimension_semantics=("parallel",),   # megacore sharding on v7x
        ),
        cost_estimate=cost,
    )(z_bf, dparams["w1"], dparams["b1"], dparams["w2"], dparams["b2"])

    # Drop padded batch rows (if any); the 784 -> (28, 28) reshape is layout-free.
    if b_pad != B:
        logits_flat = logits_flat[:B]
    return logits_flat.reshape(B, IMG_H, IMG_W)


def init_params(key, latent_dim, hidden_dim):
    """Deterministic parameter init (mimics nn.Linear default-ish scaling)."""
    k1, k2, k3, k4 = jax.random.split(key, 4)
    w1 = jax.random.normal(k1, (latent_dim, hidden_dim), jnp.float32) * (1.0 / jnp.sqrt(latent_dim))
    b1 = jax.random.normal(k2, (1, hidden_dim), jnp.float32) * 0.01
    w2 = jax.random.normal(k3, (hidden_dim, OUT_DIM), jnp.float32) * (1.0 / jnp.sqrt(hidden_dim))
    b2 = jax.random.normal(k4, (1, OUT_DIM), jnp.float32) * 0.01
    # Present in the PyTorch module but unused by forward():
    std = jnp.ones((IMG_H, IMG_W), jnp.float32) * 0.5
    return {"w1": w1, "b1": b1, "w2": w2, "b2": b2, "std": std}


if __name__ == "__main__":
    key = jax.random.PRNGKey(0)
    kz, kp = jax.random.split(key)

    batch = 2
    latent_dim = 8     # M
    hidden_dim = 128   # H (lane-aligned)

    params = init_params(kp, latent_dim, hidden_dim)
    # Weight prep (bf16 cast / bias reshape) happens once, outside the forward path.
    dparams = prepare_decoder_params(params)
    z = jax.random.normal(kz, (batch, latent_dim), jnp.float32)

    decoder = jax.jit(lambda zz: bernoulli_decoder_forward(zz, dparams))
    logits = decoder(z)
    jax.block_until_ready(logits)

    # Shapes match the base-dist parameter of td.Independent(td.Bernoulli(logits), 2).
    assert logits.shape == (batch, IMG_H, IMG_W)
    assert logits.dtype == jnp.bfloat16
    probs = jax.nn.sigmoid(logits.astype(jnp.float32))   # td.Bernoulli(logits).probs
    assert probs.shape == (batch, IMG_H, IMG_W)

    logits_f32 = logits.astype(jnp.float32)

    # Reference 1: same bf16-weight / bf16-output decoder in plain JAX (tight-ish tol).
    z_bf = z.astype(jnp.bfloat16)
    h_bf = jnp.maximum(
        jnp.dot(z_bf, dparams["w1"], preferred_element_type=jnp.float32)
        + dparams["b1"], 0.0)
    logits_bf_ref = (jnp.dot(h_bf.astype(jnp.bfloat16), dparams["w2"],
                             preferred_element_type=jnp.float32)
                     + dparams["b2"]).astype(jnp.bfloat16)
    logits_bf_ref = logits_bf_ref.astype(jnp.float32).reshape(batch, IMG_H, IMG_W)
    assert jnp.allclose(logits_f32, logits_bf_ref, atol=2e-2, rtol=2e-2)

    # Reference 2: full-f32 decoder (loose tolerance; bf16 weight + output quantization).
    h_ref = jnp.maximum(z @ params["w1"] + params["b1"], 0.0)
    logits_f32_ref = (h_ref @ params["w2"] + params["b2"]).reshape(batch, IMG_H, IMG_W)
    assert jnp.allclose(logits_f32, logits_f32_ref, atol=6e-2, rtol=6e-2)
    assert jnp.allclose(probs, jax.nn.sigmoid(logits_f32_ref), atol=5e-2)

    print("KERNEL_OK")
</pallas_src>

<mosaic_0001>
module attributes {stable_mosaic.version = 11 : i64} {
  func.func @bernoulli_decoder_kernel(%arg0: i32, %arg1: memref<16x8xbf16, #tpu.memory_space<vmem>>, %arg2: memref<8x128xbf16, #tpu.memory_space<vmem>>, %arg3: memref<1x128xf32, #tpu.memory_space<vmem>>, %arg4: memref<128x784xbf16, #tpu.memory_space<vmem>>, %arg5: memref<1x784xf32, #tpu.memory_space<vmem>>, %arg6: memref<16x784xbf16, #tpu.memory_space<vmem>>) attributes {dimension_semantics = [#tpu.dimension_semantics<parallel>], iteration_bounds = array<i64: 1>, scalar_prefetch = 0 : i64, scratch_operands = 0 : i64, tpu.core_type = #tpu.core_type<tc>, window_params = [{transform_indices = @transform_0, window_bounds = array<i64: 16, 8>}, {pipeline_mode = #tpu.pipeline_mode<synchronous>, transform_indices = @transform_1, window_bounds = array<i64: 8, 128>}, {pipeline_mode = #tpu.pipeline_mode<synchronous>, transform_indices = @transform_2, window_bounds = array<i64: 1, 128>}, {pipeline_mode = #tpu.pipeline_mode<synchronous>, transform_indices = @transform_3, window_bounds = array<i64: 128, 784>}, {pipeline_mode = #tpu.pipeline_mode<synchronous>, transform_indices = @transform_4, window_bounds = array<i64: 1, 784>}, {transform_indices = @transform_5, window_bounds = array<i64: 16, 784>}]} {
    %c0 = arith.constant 0 : index
    %c0_0 = arith.constant 0 : index
    %0 = vector.load %arg1[%c0, %c0_0] : memref<16x8xbf16, #tpu.memory_space<vmem>>, vector<16x8xbf16>
    %c0_1 = arith.constant 0 : index
    %c0_2 = arith.constant 0 : index
    %1 = vector.load %arg2[%c0_1, %c0_2] : memref<8x128xbf16, #tpu.memory_space<vmem>>, vector<8x128xbf16>
    %cst = arith.constant dense<0.000000e+00> : vector<16x128xf32>
    %2 = tpu.matmul %0, %1, %cst {dimension_numbers = #tpu.dot_dimension_numbers<[1], [0], [0], [1], [0, 0, 1, 1], [], []>} : vector<16x8xbf16>, vector<8x128xbf16>, vector<16x128xf32> -> vector<16x128xf32>
    %c0_3 = arith.constant 0 : index
    %c0_4 = arith.constant 0 : index
    %3 = vector.load %arg3[%c0_3, %c0_4] : memref<1x128xf32, #tpu.memory_space<vmem>>, vector<1x128xf32>
    %4 = vector.broadcast %3 : vector<1x128xf32> to vector<16x128xf32>
    %5 = arith.addf %2, %4 : vector<16x128xf32>
    %cst_5 = arith.constant 0.000000e+00 : f32
    %6 = vector.broadcast %cst_5 : f32 to vector<16x128xf32>
    %7 = arith.maximumf %5, %6 : vector<16x128xf32>
    %8 = arith.truncf %7 : vector<16x128xf32> to vector<16x128xbf16>
    %c0_6 = arith.constant 0 : index
    %c0_7 = arith.constant 0 : index
    %9 = vector.load %arg4[%c0_6, %c0_7] : memref<128x784xbf16, #tpu.memory_space<vmem>>, vector<128x784xbf16>
    %cst_8 = arith.constant dense<0.000000e+00> : vector<16x784xf32>
    %10 = tpu.matmul %8, %9, %cst_8 {dimension_numbers = #tpu.dot_dimension_numbers<[1], [0], [0], [1], [0, 0, 1, 1], [], []>} : vector<16x128xbf16>, vector<128x784xbf16>, vector<16x784xf32> -> vector<16x784xf32>
    %c0_9 = arith.constant 0 : index
    %c0_10 = arith.constant 0 : index
    %11 = vector.load %arg5[%c0_9, %c0_10] : memref<1x784xf32, #tpu.memory_space<vmem>>, vector<1x784xf32>
    %12 = vector.broadcast %11 : vector<1x784xf32> to vector<16x784xf32>
    %13 = arith.addf %10, %12 : vector<16x784xf32>
    %14 = arith.truncf %13 : vector<16x784xf32> to vector<16x784xbf16>
    %c0_11 = arith.constant 0 : index
    %c0_12 = arith.constant 0 : index
    %15 = vector.load %arg6[%c0_11, %c0_12] : memref<16x784xbf16, #tpu.memory_space<vmem>>, vector<16x784xbf16>
    tpu.vector_store %arg6[%c0_11, %c0_12], %14 {strides = array<i32>} : memref<16x784xbf16, #tpu.memory_space<vmem>>, vector<16x784xbf16>,
    return
  }
  func.func @transform_0(%arg0: i32) -> (i32, i32) {
    %c0_i32 = arith.constant 0 : i32
    %c0_i32_0 = arith.constant 0 : i32
    return %arg0, %c0_i32 : i32, i32
  }
  func.func @transform_1(%arg0: i32) -> (i32, i32) {
    %c0_i32 = arith.constant 0 : i32
    %c0_i32_0 = arith.constant 0 : i32
    %c0_i32_1 = arith.constant 0 : i32
    return %c0_i32, %c0_i32_0 : i32, i32
  }
  func.func @transform_2(%arg0: i32) -> (i32, i32) {
    %c0_i32 = arith.constant 0 : i32
    %c0_i32_0 = arith.constant 0 : i32
    %c0_i32_1 = arith.constant 0 : i32
    return %c0_i32, %c0_i32_0 : i32, i32
  }
  func.func @transform_3(%arg0: i32) -> (i32, i32) {
    %c0_i32 = arith.constant 0 : i32
    %c0_i32_0 = arith.constant 0 : i32
    %c0_i32_1 = arith.constant 0 : i32
    return %c0_i32, %c0_i32_0 : i32, i32
  }
  func.func @transform_4(%arg0: i32) -> (i32, i32) {
    %c0_i32 = arith.constant 0 : i32
    %c0_i32_0 = arith.constant 0 : i32
    %c0_i32_1 = arith.constant 0 : i32
    return %c0_i32, %c0_i32_0 : i32, i32
  }
  func.func @transform_5(%arg0: i32) -> (i32, i32) {
    %c0_i32 = arith.constant 0 : i32
    %c0_i32_0 = arith.constant 0 : i32
    return %arg0, %c0_i32 : i32, i32
  }
}

</mosaic_0001>

<bundles_post_ra>
// kernel: _lambda_.1
= control target key start
LH: loop header
LB: loop body
LE: loop exit
PB: predicated region body
PF: predicated region fallthrough
CT: control target
= control target key end

     0   :  { %vm40_vm0 = vcmask 1043456   ;;  %v900_v0 = vmov 0.0   ;;  %vm901_vm1 = vmmov 0   ;;  %vm36_vm2 = vcmask 64512   ;;  %s1150_s1 = inlined_call_operand.vmem [shape: bf16[8,128], index: 1, kind: input, shape index: {}]   ;;  %s1151_s0 = inlined_call_operand.vmem [shape: bf16[16,8], index: 0, kind: input, shape index: {}]   ;;  %s1152_s3 = inlined_call_operand.vmem [shape: bf16[128,784], index: 3, kind: input, shape index: {}]   ;;  %s1153_s2 = inlined_call_operand.vmem [shape: f32[1,128], index: 2, kind: input, shape index: {}]   ;;  %s1154_s4 = inlined_call_operand.vmem [shape: f32[1,784], index: 4, kind: input, shape index: {}]   ;;  %s1155_s5 = inlined_call_operand.vmem [shape: bf16[16,784], index: 5, kind: output, shape index: {}]  }
   0x1   :  { %790 = vmatprep.subr.bf16.mxu0 %v900_v0  ;;  %v23_v1 = vld [vmem:[%s1150_s1] sm:$0xf]  ;;  %792 = vmatprep.mubr.msk.bf16.mxu0 %vm901_vm1, %v900_v0  ;;  %v822_v5 = vld [vmem:[%s1152_s3 + $0x8] ss:$28 sps:$4 sm:$0xff]   ;;  %v826_v8 = vld [vmem:[%s1152_s3 + $0x3c] ss:$28 sps:$4 sm:$0xff]  }
   0x2   :  { %v42_v2 = vsel %vm40_vm0, %v23_v1, 0  ;;  %v819_v3 = vld [vmem:[%s1151_s0] sm:$0xff]   ;;  %v824_v6 = vld [vmem:[%s1152_s3 + $0xc] ss:$28 sps:$4 sm:$0xff]   ;;  %v831_v11 = vld [vmem:[%s1152_s3 + $0x38] ss:$28 sps:$4 sm:$0xff]  }
   0x3   :  { %791 = vmatpush3.bf16.msra.mxu0 %v42_v2  ;;  %v820_v4 = vld [vmem:[%s1152_s3 + $0x4] ss:$28 sps:$4 sm:$0xff]   ;;  %v832_v12 = vld [vmem:[%s1152_s3 + $0x74] ss:$28 sps:$4 sm:$0xff]   ;;  %v836_v13 = vld [vmem:[%s1152_s3 + $0x7c] ss:$28 sps:$4 sm:$0xff]  }
   0x4   :  { %v825_v7 = vld [vmem:[%s1152_s3] ss:$28 sps:$4 sm:$0xff]   ;;  %477 = vmatprep.subr.bf16.mxu1 %v820_v4  ;;  %520 = vmatprep.subr.bf16.mxu0 %v824_v6  ;;  %v834_v14 = vld [vmem:[%s1152_s3 + $0x78] ss:$28 sps:$4 sm:$0xff]   ;;  %v837_v15 = vld [vmem:[%s1152_s3 + $0x70] ss:$28 sps:$4 sm:$0xff]  }
   0x5   :  { %v828_v9 = vld [vmem:[%s1152_s3 + $0x40] ss:$28 sps:$4 sm:$0xff]   ;;  %478 = vmatpush1.bf16.msra.mxu1 %v825_v7  ;;  %v838_v16 = vld [vmem:[%s1152_s3 + $0xac] ss:$28 sps:$4 sm:$0xff]   ;;  %v842_v17 = vld [vmem:[%s1152_s3 + $0xb4] ss:$28 sps:$4 sm:$0xff]  }
   0x6   :  { %793 = vmatmul.mubr.msk.bf16.vlgmr.msra.gmra.mrb[0].mxu0 %vm36_vm2, %v819_v3  ;;  %v830_v10 = vld [vmem:[%s1152_s3 + $0x44] ss:$28 sps:$4 sm:$0xff]   ;;  %479 = vmatprep.subr.bf16.mxu1 %v826_v8  ;;  %v840_v18 = vld [vmem:[%s1152_s3 + $0xb0] ss:$28 sps:$4 sm:$0xff]   ;;  %v850_v24 = vld [vmem:[%s1152_s3 + $0x11c] ss:$28 sps:$4 sm:$0xff]   ;;  %v154_v8 = vlaneseq }
   0x7   :  { %521 = vmatpush1.bf16.msra.mxu0 %v822_v5  ;;  %v843_v19 = vld [vmem:[%s1152_s3 + $0xa8] ss:$28 sps:$4 sm:$0xff]   ;;  %v849_v23 = vld [vmem:[%s1152_s3 + $0xe0] ss:$28 sps:$4 sm:$0xff]   ;;  %v855_v27 = vld [vmem:[%s1152_s3 + $0x118] ss:$28 sps:$4 sm:$0xff]  }
   0x8   :  { %522 = vmatprep.subr.bf16.mxu0 %v830_v10  ;;  %v844_v20 = vld [vmem:[%s1152_s3 + $0xe4] ss:$28 sps:$4 sm:$0xff]   ;;  %v848_v21 = vld [vmem:[%s1152_s3 + $0xec] ss:$28 sps:$4 sm:$0xff]   ;;  %v856_v28 = vld [vmem:[%s1152_s3 + $0x154] ss:$28 sps:$4 sm:$0xff]  }
   0x9   :  { %480 = vmatpush1.bf16.msra.mxu1 %v831_v11  ;;  %v846_v22 = vld [vmem:[%s1152_s3 + $0xe8] ss:$28 sps:$4 sm:$0xff]   ;;  %v852_v26 = vld [vmem:[%s1152_s3 + $0x120] ss:$28 sps:$4 sm:$0xff]   ;;  %v858_v30 = vld [vmem:[%s1152_s3 + $0x158] ss:$28 sps:$4 sm:$0xff]  }
   0xa   :  { %481 = vmatprep.subr.bf16.mxu1 %v832_v12  ;;  %v854_v25 = vld [vmem:[%s1152_s3 + $0x124] ss:$28 sps:$4 sm:$0xff]   ;;  %v860_v29 = vld [vmem:[%s1152_s3 + $0x15c] ss:$28 sps:$4 sm:$0xff]   ;;  %v861_v31 = vld [vmem:[%s1152_s3 + $0x150] ss:$28 sps:$4 sm:$0xff]  }
   0xb   :  { %523 = vmatpush1.bf16.msra.mxu0 %v828_v9  ;;  %v862_v32 = vld [vmem:[%s1152_s3 + $0x18c] ss:$28 sps:$4 sm:$0xff]   ;;  %v866_v33 = vld [vmem:[%s1152_s3 + $0x194] ss:$28 sps:$4 sm:$0xff]   ;;  %v902_v37 = vmov 0   ;;  %v155_v9 = vshrl.u32 %v154_v8, 7 }
   0xc   :  { %524 = vmatprep.subr.bf16.mxu0 %v836_v13  ;;  %v864_v34 = vld [vmem:[%s1152_s3 + $0x190] ss:$28 sps:$4 sm:$0xff]   ;;  %v867_v35 = vld [vmem:[%s1152_s3 + $0x188] ss:$28 sps:$4 sm:$0xff]   ;;  %509 = vmatprep.mubr.bf16.mxu1 %v902_v37  ;;  %v704_v38 = vld [vmem:[%s1153_s2] ss:$0 sm:$0xff] }
   0xd   :  { %482 = vmatpush1.bf16.msra.mxu1 %v837_v15  ;;  %v870_v36 = vld [vmem:[%s1152_s3 + $0x14] ss:$28 sps:$4 sm:$0xff]   ;;  %552 = vmatprep.mubr.bf16.mxu0 %v902_v37  ;;  %v874_v50 = vld [vmem:[%s1152_s3 + $0x4c] ss:$28 sps:$4 sm:$0xff]   ;;  %v878_v53 = vld [vmem:[%s1152_s3 + $0x84] ss:$28 sps:$4 sm:$0xff]  }
   0xe   :  { %483 = vmatprep.subr.bf16.mxu1 %v838_v16  ;;  %v868_v47 = vld [vmem:[%s1152_s3 + $0x10] ss:$28 sps:$4 sm:$0xff]   ;;  %v871_v48 = vld [vmem:[%s1152_s3 + $0x18] ss:$28 sps:$4 sm:$0xff]   ;;  %v872_v51 = vld [vmem:[%s1152_s3 + $0x48] ss:$28 sps:$4 sm:$0xff]  }
   0xf   :  { %525 = vmatpush1.bf16.msra.mxu0 %v834_v14  ;;  %v875_v52 = vld [vmem:[%s1152_s3 + $0x50] ss:$28 sps:$4 sm:$0xff]   ;;  %v876_v54 = vld [vmem:[%s1152_s3 + $0x80] ss:$28 sps:$4 sm:$0xff]   ;;  %v879_v55 = vld [vmem:[%s1152_s3 + $0x88] ss:$28 sps:$4 sm:$0xff]  }
  0x10   :  { %526 = vmatprep.subr.bf16.mxu0 %v842_v17  ;;  %v882_v56 = vld [vmem:[%s1152_s3 + $0xbc] ss:$28 sps:$4 sm:$0xff]   ;;  %v886_v59 = vld [vmem:[%s1152_s3 + $0xf4] ss:$28 sps:$4 sm:$0xff]   ;;  %v890_v62 = vld [vmem:[%s1152_s3 + $0x12c] ss:$28 sps:$4 sm:$0xff]  }
  0x11   :  { %484 = vmatpush1.bf16.msra.mxu1 %v843_v19  ;;  %v880_v57 = vld [vmem:[%s1152_s3 + $0xb8] ss:$28 sps:$4 sm:$0xff]   ;;  %v883_v58 = vld [vmem:[%s1152_s3 + $0xc0] ss:$28 sps:$4 sm:$0xff]   ;;  %v884_v60 = vld [vmem:[%s1152_s3 + $0xf0] ss:$28 sps:$4 sm:$0xff]  }
  0x12   :  { %485 = vmatprep.subr.bf16.mxu1 %v844_v20  ;;  %v887_v61 = vld [vmem:[%s1152_s3 + $0xf8] ss:$28 sps:$4 sm:$0xff]   ;;  %v888_v63 = vld [vmem:[%s1152_s3 + $0x128] ss:$28 sps:$4 sm:$0xff]   ;;  %v891_v1 = vld [vmem:[%s1152_s3 + $0x130] ss:$28 sps:$4 sm:$0xff]  }
  0x13   :  { %527 = vmatpush1.bf16.msra.mxu0 %v840_v18  ;;  %v894_v2 = vld [vmem:[%s1152_s3 + $0x164] ss:$28 sps:$4 sm:$0xff]   ;;  %v898_v5 = vld [vmem:[%s1152_s3 + $0x19c] ss:$28 sps:$4 sm:$0xff]   ;;  %v156_v10 = vsub.s32 0, %v155_v9  ;;  %v164_v11 = vsub.s32 2, %v155_v9 }
  0x14   :  { %528 = vmatprep.subr.bf16.mxu0 %v848_v21  ;;  %v892_v3 = vld [vmem:[%s1152_s3 + $0x160] ss:$28 sps:$4 sm:$0xff]   ;;  %v895_v4 = vld [vmem:[%s1152_s3 + $0x168] ss:$28 sps:$4 sm:$0xff]   ;;  %v896_v6 = vld [vmem:[%s1152_s3 + $0x198] ss:$28 sps:$4 sm:$0xff]  }
  0x15   :  { %486 = vmatpush1.bf16.msra.mxu1 %v849_v23  ;;  %v899_v7 = vld [vmem:[%s1152_s3 + $0x1a0] ss:$28 sps:$4 sm:$0xff]   ;;  %v160_v13 = vsub.s32 1, %v155_v9  ;;  %v168_v14 = vsub.s32 3, %v155_v9  ;;  %vm694_vm3 = vcmask 125952  }
  0x16   :  { %487 = vmatprep.subr.bf16.mxu1 %v850_v24  ;;  %v152_v12 = vld [vmem:[%s1154_s4] sm:$0x7f] }
  0x17   :  { %529 = vmatpush1.bf16.msra.mxu0 %v846_v22  ;;  %v157_v15 = vrot.slane %v152_v12, %v156_v10  ;;  %v165_v16 = vrot.slane %v152_v12, %v164_v11  ;;  %v161_v17 = vrot.slane %v152_v12, %v160_v13  ;;  %v169_v18 = vrot.slane %v152_v12, %v168_v14 }
  0x18   :  { %530 = vmatprep.subr.bf16.mxu0 %v854_v25 }
  0x19   :  { %488 = vmatpush1.bf16.msra.mxu1 %v855_v27 }
  0x1a   :  { %489 = vmatprep.subr.bf16.mxu1 %v856_v28 }
  0x1b   :  { %531 = vmatpush1.bf16.msra.mxu0 %v852_v26 }
  0x1c   :  { %532 = vmatprep.subr.bf16.mxu0 %v860_v29 }
  0x1d   :  { %490 = vmatpush1.bf16.msra.mxu1 %v861_v31 }
  0x1e   :  { %491 = vmatprep.subr.bf16.mxu1 %v862_v32 }
  0x1f   :  { %533 = vmatpush1.bf16.msra.mxu0 %v858_v30 }
  0x20   :  { %534 = vmatprep.subr.bf16.mxu0 %v866_v33 }
  0x21   :  { %492 = vmatpush1.bf16.msra.mxu1 %v867_v35 }
  0x22   :  { %563 = vmatprep.subr.bf16.mxu1 %v870_v36 }
  0x23   :  { %535 = vmatpush1.bf16.msra.mxu0 %v864_v34 }
  0x24   :  { %796 = vmatprep.subr.bf16.mxu0 %v900_v0 }
  0xd9   :  { %v78_v39 = vpop.f32.mrb[0].mxu0 }
  0xda   :  { %v79_v40 = vadd.f32 %v704_v38, %v78_v39  ;;  %v794_v41 = vpop.f32.mrb[1].mxu0  ;;  %v180_v39 = vsub.s32 6, %v155_v9 }
  0xdb   :  { %v81_v42 = vpop.f32.mrb[2].mxu0 }
  0xdc   :  { %v82_v43 = vadd.f32 %v704_v38, %v81_v42  ;;  %v795_v44 = vpop.f32.mrb[3].mxu0  ;;  %v85_v45 = vmax.f32 %v79_v40, 0.0  ;;  %v172_v38 = vsub.s32 4, %v155_v9  ;;  %v176_v40 = vsub.s32 5, %v155_v9 }
  0xdd   :  { %v181_v42 = vrot.slane %v152_v12, %v180_v39 }
  0xde   :  { %v86_v46 = vmax.f32 %v82_v43, 0.0  ;;  %v173_v41 = vrot.slane %v152_v12, %v172_v38  ;;  %v177_v43 = vrot.slane %v152_v12, %v176_v40 }
  0xe0   :  { %v87_v49 = vpack.c.bf16 %v86_v46, %v85_v45 }
  0xe2   :  { %510 = vmatmul.mubr.bf16.vlgmr.msra.gmra.mrb[0].mxu1 %v87_v49  ;;  %553 = vmatmul.mubr.bf16.vlgmr.msra.gmra.mrb[4].mxu0 %v87_v49 }
  0xe3   :  { %564 = vmatpush1.bf16.msra.mxu1 %v868_v47  ;;  %797 = vmatpush3.bf16.msra.mxu0 %v871_v48 }
  0xe4   :  { %565 = vmatprep.subr.bf16.mxu1 %v874_v50  ;;  %798 = vmatprep.subr.bf16.mxu0 %v900_v0 }
  0xe5   :  { %595 = vmatprep.mubr.bf16.mxu1 %v902_v37  ;;  %812 = vmatprep.mubr.msk.bf16.mxu0 %vm901_vm1, %v900_v0 }
  0xe7   :  { %566 = vmatpush1.bf16.msra.mxu1 %v872_v51  ;;  %799 = vmatpush3.bf16.msra.mxu0 %v875_v52 }
  0xe8   :  { %567 = vmatprep.subr.bf16.mxu1 %v878_v53  ;;  %800 = vmatprep.subr.bf16.mxu0 %v900_v0 }
  0xeb   :  { %568 = vmatpush1.bf16.msra.mxu1 %v876_v54  ;;  %801 = vmatpush3.bf16.msra.mxu0 %v879_v55 }
  0xec   :  { %569 = vmatprep.subr.bf16.mxu1 %v882_v56  ;;  %802 = vmatprep.subr.bf16.mxu0 %v900_v0 }
  0xef   :  { %570 = vmatpush1.bf16.msra.mxu1 %v880_v57  ;;  %803 = vmatpush3.bf16.msra.mxu0 %v883_v58 }
  0xf0   :  { %571 = vmatprep.subr.bf16.mxu1 %v886_v59  ;;  %804 = vmatprep.subr.bf16.mxu0 %v900_v0 }
  0xf3   :  { %572 = vmatpush1.bf16.msra.mxu1 %v884_v60  ;;  %805 = vmatpush3.bf16.msra.mxu0 %v887_v61 }
  0xf4   :  { %573 = vmatprep.subr.bf16.mxu1 %v890_v62  ;;  %806 = vmatprep.subr.bf16.mxu0 %v900_v0 }
  0xf7   :  { %574 = vmatpush1.bf16.msra.mxu1 %v888_v63  ;;  %807 = vmatpush3.bf16.msra.mxu0 %v891_v1 }
  0xf8   :  { %575 = vmatprep.subr.bf16.mxu1 %v894_v2  ;;  %808 = vmatprep.subr.bf16.mxu0 %v900_v0 }
  0xfb   :  { %576 = vmatpush1.bf16.msra.mxu1 %v892_v3  ;;  %809 = vmatpush3.bf16.msra.mxu0 %v895_v4 }
  0xfc   :  { %577 = vmatprep.subr.bf16.mxu1 %v898_v5  ;;  %810 = vmatprep.subr.bf16.mxu0 %v900_v0 }
  0xff   :  { %578 = vmatpush1.bf16.msra.mxu1 %v896_v6  ;;  %811 = vmatpush3.bf16.msra.mxu0 %v899_v7 }
 0x102   :  { %596 = vmatmul.mubr.bf16.vlgmr.msra.gmra.mrb[4].mxu1 %v87_v49  ;;  %813 = vmatmul.mubr.bf16.vlgmr.msra.gmra.mrb[8].mxu0 %v87_v49 }
 0x1b5   :  { %v511_v19 = vpop.f32.mrb[0].mxu1  ;;  %v554_v0 = vpop.f32.mrb[4].mxu0 }
 0x1b6   :  { %v512_v20 = vadd.f32 %v511_v19, %v157_v15  ;;  %v555_v21 = vadd.f32 %v554_v0, %v165_v16  ;;  %v513_v22 = vpop.f32.mrb[1].mxu1  ;;  %v556_v23 = vpop.f32.mrb[5].mxu0 }
 0x1b7   :  { %v514_v24 = vadd.f32 %v513_v22, %v161_v17  ;;  %v557_v25 = vadd.f32 %v556_v23, %v169_v18  ;;  %v515_v26 = vpop.f32.mrb[2].mxu1  ;;  %v558_v27 = vpop.f32.mrb[6].mxu0 }
 0x1b8   :  { %v516_v28 = vadd.f32 %v515_v26, %v157_v15  ;;  %v559_v29 = vadd.f32 %v558_v27, %v165_v16  ;;  %v517_v30 = vpop.f32.mrb[3].mxu1  ;;  %v560_v31 = vpop.f32.mrb[7].mxu0 }
 0x1b9   :  { %v771_v32 = vpack.c.bf16 %v514_v24, %v512_v20  ;;  %v772_v33 = vpack.c.bf16 %v557_v25, %v555_v21  ;;  %v518_v34 = vadd.f32 %v517_v30, %v161_v17  ;;  %v561_v35 = vadd.f32 %v560_v31, %v169_v18 }
 0x1bb   :  { %691 = vst [vmem:[%s1155_s5] sm:$0xff] %v771_v32  ;;  %692 = vst [vmem:[%s1155_s5 + $0x8] sm:$0xff] %v772_v33  ;;  %v775_v36 = vpack.c.bf16 %v518_v34, %v516_v28  ;;  %v776_v37 = vpack.c.bf16 %v561_v35, %v559_v29 }
 0x1bd   :  { %696 = vst [vmem:[%s1155_s5 + $0x1c] sm:$0xff] %v775_v36  ;;  %697 = vst [vmem:[%s1155_s5 + $0x24] sm:$0xff] %v776_v37 }
 0x1d5   :  { %v597_v44 = vpop.f32.mrb[4].mxu1  ;;  %v640_v45 = vpop.f32.mrb[8].mxu0 }
 0x1d6   :  { %v598_v46 = vadd.f32 %v597_v44, %v173_v41  ;;  %v641_v47 = vadd.f32 %v640_v45, %v181_v42  ;;  %v599_v48 = vpop.f32.mrb[5].mxu1  ;;  %v814_v49 = vpop.f32.mrb[9].mxu0 }
 0x1d7   :  { %v600_v50 = vadd.f32 %v599_v48, %v177_v43  ;;  %v601_v51 = vpop.f32.mrb[6].mxu1  ;;  %v643_v52 = vpop.f32.mrb[10].mxu0 }
 0x1d8   :  { %v774_v53 = vpack.c.bf16 %v641_v47, %v641_v47  ;;  %v602_v54 = vadd.f32 %v601_v51, %v173_v41  ;;  %v644_v55 = vadd.f32 %v643_v52, %v181_v42  ;;  %v603_v56 = vpop.f32.mrb[7].mxu1  ;;  %v815_v57 = vpop.f32.mrb[11].mxu0 }
 0x1d9   :  { %v773_v58 = vpack.c.bf16 %v600_v50, %v598_v46  ;;  %v604_v59 = vadd.f32 %v603_v56, %v177_v43 }
 0x1da   :  { %695 = vst.msk [vmem:[%s1155_s5 + $0x18] sm:$0xf] %vm694_vm3, %v774_v53  ;;  %v778_v60 = vpack.c.bf16 %v644_v55, %v644_v55 }
 0x1db   :  { %693 = vst [vmem:[%s1155_s5 + $0x10] sm:$0xff] %v773_v58  ;;  %v777_v61 = vpack.c.bf16 %v604_v59, %v602_v54 }
 0x1dc   :  { %699 = vst.msk [vmem:[%s1155_s5 + $0x34] sm:$0xf] %vm694_vm3, %v778_v60 }
 0x1dd   :  { %698 = vst [vmem:[%s1155_s5 + $0x2c] sm:$0xff] %v777_v61 }

</bundles_post_ra>
